<compile_context>
chip_gen: v7x
topology: tpu7x:2x2x1
jax: 0.10.0
libtpu: 0.0.40
codegen_flags: <defaults>
</compile_context>

<pallas_src>
import functools

import jax
import jax.numpy as jnp
from jax.experimental import pallas as pl
from jax.experimental.pallas import tpu as pltpu


def _round_up(x, m):
    return ((x + m - 1) // m) * m


def _sublane_multiple(dtype):
    # f32 -> 8, bf16 -> 16, int8/fp8 -> 32 (minimum TPU tile second-minor dim).
    return max(8, 32 // jnp.dtype(dtype).itemsize)


def _rmsle_tile_kernel(pred_ref, actual_ref, o_ref, *, valid_rows, need_mask):
    i = pl.program_id(0)

    @pl.when(i == 0)
    def _():
        o_ref[...] = jnp.zeros_like(o_ref)

    p = pred_ref[...].astype(jnp.float32)
    a = actual_ref[...].astype(jnp.float32)

    # One EUP log per element instead of two log1p's.  Exact division keeps
    # zero-padded elements contributing exactly log((1+0)/(1+0)) == 0.
    d = jnp.log((1.0 + p) / (1.0 + a))
    sq = d * d

    if need_mask:
        # Last tile may extend past the real row count (Pallas clips the DMA,
        # leaving garbage rows in the block); zero them before accumulating.
        tile_rows = sq.shape[0]
        row_idx = i * tile_rows + jax.lax.broadcasted_iota(
            jnp.int32, (tile_rows, 1), 0)
        sq = jnp.where(row_idx < valid_rows, sq, 0.0)

    # (tile_rows, 128) -> (tile_rows//8, 8, 128), reduce over the major axis:
    # pure vreg-wise VPU adds, no cross-lane/sublane movement on the hot path.
    o_ref[...] += sq.reshape(-1, 8, sq.shape[-1]).sum(axis=0)


def rmsle_loss(pred, actual, *, max_tile_rows=4096, lanes=128):
    """Pallas implementation of RMSLELoss.forward (MSE of log(x+1)'s, no sqrt)."""
    assert pred.shape == actual.shape, "pred/actual must match shapes"
    total = int(pred.size)
    assert total > 0

    flat_p = pred.reshape(-1)
    flat_a = actual.reshape(-1)

    rows = pl.cdiv(total, lanes)
    rem = total % lanes
    if rem != 0:
        # Ragged tail: pad ONLY up to the next multiple of 128 (< 128 zeros).
        # Aligned inputs (the common case) pay no copy at all.
        pad = lanes - rem
        flat_p = jnp.pad(flat_p, (0, pad))
        flat_a = jnp.pad(flat_a, (0, pad))

    p2 = flat_p.reshape(rows, lanes)
    a2 = flat_a.reshape(rows, lanes)

    sub = max(_sublane_multiple(pred.dtype), _sublane_multiple(actual.dtype))
    tile_rows = min(_round_up(max_tile_rows, sub), _round_up(rows, sub))
    num_tiles = pl.cdiv(rows, tile_rows)
    need_mask = (num_tiles * tile_rows) != rows

    kernel = functools.partial(
        _rmsle_tile_kernel, valid_rows=rows, need_mask=need_mask)

    # TODO(synk): on v7x, a leading CORE_PARALLEL grid axis of size 2 could
    # shard this streaming reduction across both TensorCores; kept single-axis
    # "arbitrary" here for portability across v5e/v6e/v7x.
    partial_sums = pl.pallas_call(
        kernel,
        out_shape=jax.ShapeDtypeStruct((8, lanes), jnp.float32),
        grid_spec=pltpu.PrefetchScalarGridSpec(
            num_scalar_prefetch=0,
            grid=(num_tiles,),
            in_specs=[
                pl.BlockSpec((tile_rows, lanes), lambda i: (i, 0)),
                pl.BlockSpec((tile_rows, lanes), lambda i: (i, 0)),
            ],
            out_specs=pl.BlockSpec((8, lanes), lambda i: (0, 0)),
        ),
        compiler_params=pltpu.CompilerParams(
            dimension_semantics=("arbitrary",),
            vmem_limit_bytes=32 * 1024 * 1024,
        ),
    )(p2, a2)

    # Tiny final reduce + normalization by the ORIGINAL element count
    # (padding and masked rows contribute exactly zero).
    return jnp.sum(partial_sums) / jnp.float32(total)


def _reference(pred, actual):
    return jnp.mean((jnp.log(pred.astype(jnp.float32) + 1.0)
                     - jnp.log(actual.astype(jnp.float32) + 1.0)) ** 2)


if __name__ == "__main__":
    key = jax.random.PRNGKey(0)
    keys = jax.random.split(key, 8)

    # Main example: (batch=2, C=4, H=16, W=16), positive-valued (RMSLE domain).
    # total = 2048 -> exactly 16 lane-rows: no padding, no masking, no copy.
    shape = (2, 4, 16, 16)
    pred = jax.random.uniform(keys[0], shape, dtype=jnp.float32, minval=0.0, maxval=10.0)
    actual = jax.random.uniform(keys[1], shape, dtype=jnp.float32, minval=0.0, maxval=10.0)
    loss = jax.block_until_ready(rmsle_loss(pred, actual))
    ref = _reference(pred, actual)
    assert jnp.allclose(loss, ref, rtol=1e-5, atol=1e-6), (loss, ref)

    # Ragged shape (not a multiple of 128): exercises the small pad-to-128
    # path AND the in-kernel tail-row mask (rows=9 < tile_rows=16).
    shape2 = (3, 7, 50)
    p2 = jax.random.uniform(keys[2], shape2, dtype=jnp.float32, minval=0.0, maxval=5.0)
    a2 = jax.random.uniform(keys[3], shape2, dtype=jnp.float32, minval=0.0, maxval=5.0)
    l2 = jax.block_until_ready(rmsle_loss(p2, a2))
    r2 = _reference(p2, a2)
    assert jnp.allclose(l2, r2, rtol=1e-5, atol=1e-6), (l2, r2)

    # Multi-tile accumulation + edge-block masking with a small tile override
    # (132 rows, tile_rows=48 -> 3 tiles, last one partially valid).
    shape3 = (4, 33, 128)
    p3 = jax.random.uniform(keys[4], shape3, dtype=jnp.float32, minval=0.0, maxval=10.0)
    a3 = jax.random.uniform(keys[5], shape3, dtype=jnp.float32, minval=0.0, maxval=10.0)
    l3 = jax.block_until_ready(rmsle_loss(p3, a3, max_tile_rows=48))
    r3 = _reference(p3, a3)
    assert jnp.allclose(l3, r3, rtol=1e-5, atol=1e-6), (l3, r3)

    # bf16 inputs: exercises dtype-aware sublane rounding (min (16,128) tile)
    # and in-kernel upcast (streams bf16, accumulates f32).
    p4 = jax.random.uniform(keys[6], shape, dtype=jnp.bfloat16, minval=0.0, maxval=10.0)
    a4 = jax.random.uniform(keys[7], shape, dtype=jnp.bfloat16, minval=0.0, maxval=10.0)
    l4 = jax.block_until_ready(rmsle_loss(p4, a4))
    r4 = _reference(p4, a4)
    assert jnp.allclose(l4, r4, rtol=1e-5, atol=1e-6), (l4, r4)

    print("KERNEL_OK")
</pallas_src>

<mosaic_0001>
module attributes {stable_mosaic.version = 11 : i64} {
  func.func @_rmsle_tile_kernel(%arg0: i32, %arg1: memref<16x128xf32, #tpu.memory_space<vmem>>, %arg2: memref<16x128xf32, #tpu.memory_space<vmem>>, %arg3: memref<8x128xf32, #tpu.memory_space<vmem>>) attributes {dimension_semantics = [#tpu.dimension_semantics<arbitrary>], iteration_bounds = array<i64: 1>, scalar_prefetch = 0 : i64, scratch_operands = 0 : i64, tpu.core_type = #tpu.core_type<tc>, window_params = [{transform_indices = @transform_0, window_bounds = array<i64: 16, 128>}, {transform_indices = @transform_1, window_bounds = array<i64: 16, 128>}, {pipeline_mode = #tpu.pipeline_mode<synchronous>, transform_indices = @transform_2, window_bounds = array<i64: 8, 128>}]} {
    %c0_i32 = arith.constant 0 : i32
    %0 = arith.cmpi eq, %arg0, %c0_i32 : i32
    %1 = arith.extui %0 : i1 to i32
    %c0_i32_0 = arith.constant 0 : i32
    %2 = arith.cmpi ne, %1, %c0_i32_0 : i32
    scf.if %2 {
      %cst_10 = arith.constant 0.000000e+00 : f32
      %17 = vector.broadcast %cst_10 : f32 to vector<8x128xf32>
      %c0_11 = arith.constant 0 : index
      %c0_12 = arith.constant 0 : index
      %18 = vector.load %arg3[%c0_11, %c0_12] : memref<8x128xf32, #tpu.memory_space<vmem>>, vector<8x128xf32>
      tpu.vector_store %arg3[%c0_11, %c0_12], %17 {strides = array<i32>} : memref<8x128xf32, #tpu.memory_space<vmem>>, vector<8x128xf32>,
    } else {
    }
    %c0 = arith.constant 0 : index
    %c0_1 = arith.constant 0 : index
    %3 = vector.load %arg1[%c0, %c0_1] : memref<16x128xf32, #tpu.memory_space<vmem>>, vector<16x128xf32>
    %c0_2 = arith.constant 0 : index
    %c0_3 = arith.constant 0 : index
    %4 = vector.load %arg2[%c0_2, %c0_3] : memref<16x128xf32, #tpu.memory_space<vmem>>, vector<16x128xf32>
    %cst = arith.constant 1.000000e+00 : f32
    %5 = vector.broadcast %cst : f32 to vector<16x128xf32>
    %6 = arith.addf %5, %3 : vector<16x128xf32>
    %cst_4 = arith.constant 1.000000e+00 : f32
    %7 = vector.broadcast %cst_4 : f32 to vector<16x128xf32>
    %8 = arith.addf %7, %4 : vector<16x128xf32>
    %9 = arith.divf %6, %8 : vector<16x128xf32>
    %10 = math.log %9 : vector<16x128xf32>
    %11 = arith.mulf %10, %10 : vector<16x128xf32>
    %c0_5 = arith.constant 0 : index
    %c0_6 = arith.constant 0 : index
    %12 = vector.load %arg3[%c0_5, %c0_6] : memref<8x128xf32, #tpu.memory_space<vmem>>, vector<8x128xf32>
    %13 = vector.shape_cast %11 : vector<16x128xf32> to vector<2x8x128xf32>
    %cst_7 = arith.constant dense<0.000000e+00> : vector<8x128xf32>
    %14 = vector.multi_reduction <add>, %13, %cst_7 [0] : vector<2x8x128xf32> to vector<8x128xf32>
    %15 = arith.addf %12, %14 : vector<8x128xf32>
    %c0_8 = arith.constant 0 : index
    %c0_9 = arith.constant 0 : index
    %16 = vector.load %arg3[%c0_8, %c0_9] : memref<8x128xf32, #tpu.memory_space<vmem>>, vector<8x128xf32>
    tpu.vector_store %arg3[%c0_8, %c0_9], %15 {strides = array<i32>} : memref<8x128xf32, #tpu.memory_space<vmem>>, vector<8x128xf32>,
    return
  }
  func.func @transform_0(%arg0: i32) -> (i32, i32) {
    %c0_i32 = arith.constant 0 : i32
    %c0_i32_0 = arith.constant 0 : i32
    return %arg0, %c0_i32 : i32, i32
  }
  func.func @transform_1(%arg0: i32) -> (i32, i32) {
    %c0_i32 = arith.constant 0 : i32
    %c0_i32_0 = arith.constant 0 : i32
    return %arg0, %c0_i32 : i32, i32
  }
  func.func @transform_2(%arg0: i32) -> (i32, i32) {
    %c0_i32 = arith.constant 0 : i32
    %c0_i32_0 = arith.constant 0 : i32
    %c0_i32_1 = arith.constant 0 : i32
    return %c0_i32, %c0_i32_0 : i32, i32
  }
}

</mosaic_0001>

<bundles_post_ra>
// kernel: tpu_custom_call.1
= control target key start
LH: loop header
LB: loop body
LE: loop exit
PB: predicated region body
PF: predicated region fallthrough
CT: control target
= control target key end

     0   :  { %7 = vsyncpa [#allocation3], 0  ;;  %s225_s0 = inlined_call_operand.hbm [shape: f32[16,128], index: 0, kind: input, shape index: {}]   ;;  %s226_s1 = inlined_call_operand.hbm [shape: f32[16,128], index: 1, kind: input, shape index: {}]   ;;  %s227_s2 = inlined_call_operand.hbm [shape: f32[8,128], index: 2, kind: output, shape index: {}]  }
   0x1   :  { %8 = vsyncpa [#allocation6], 0 }
   0x2   :  { %9 = vsyncpa [#allocation4], 0  ;;  %s169_s9 = smov [#allocation2]   ;;  %s97_s13 = scalar_lea.hbm %s225_s0, 256 }
   0x3   :  { %s15_s10 = sshll.u32 %s169_s9, 4  ;;  %p98_p0 = scmp.ne.s32.totalorder %s225_s0, %s97_s13  ;;  %s16_s10 = int_to_ptr.vmem [resolvable:$true] %s15_s10 }
   0x4   :  { %p101_p1 = scmp.lt.u32.totalorder %s97_s13, %s225_s0 }
   0x6   :  { %p103_p2 = pnand %p101_p1, %p98_p0 }
   0x8   :  { %106 = shalt.err (!%p103_p2)
}
   0x9   :  { %s107_s18 = scalar_lea.vmem %s16_s10, 256  ;;  %p112_p4 = scmp.lt.s32.totalorder %s16_s10, %s16_s10 }
   0xa   :  { %p108_p3 = scmp.ne.s32.totalorder %s16_s10, %s107_s18  ;;  %p113_p5 = scmp.lt.s32.totalorder %s107_s18, %s107_s18 }
   0xc   :  { %p114_p6 = por %p113_p5, %p112_p4 }
   0xe   :  { %p115_p7 = pnand %p114_p6, %p108_p3 }
  0x10   :  { %118 = shalt.err (!%p115_p7)
}
  0x11   :  { %s170_s19 = smov 128   ;;  %s171_s20 = smov 8  }
  0x12   :  { %21 = dma.hbm_to_vmem [thread:$0]  %s225_s0, 256, %s16_s10, [#allocation3], %s170_s19, %s170_s19, %s171_s20  }
  0x13   :  { %s172_s23 = smov [#allocation5]   ;;  %s119_s27 = scalar_lea.hbm %s226_s1, 256 }
  0x14   :  { %s27_s24 = sshll.u32 %s172_s23, 4  ;;  %p120_p8 = scmp.ne.s32.totalorder %s226_s1, %s119_s27  ;;  %s28_s24 = int_to_ptr.vmem [resolvable:$true] %s27_s24 }
  0x15   :  { %p123_p9 = scmp.lt.u32.totalorder %s119_s27, %s226_s1 }
  0x17   :  { %p125_p10 = pnand %p123_p9, %p120_p8 }
  0x19   :  { %128 = shalt.err (!%p125_p10)
}
  0x1a   :  { %s129_s4 = scalar_lea.vmem %s28_s24, 256  ;;  %p134_p12 = scmp.lt.s32.totalorder %s28_s24, %s28_s24 }
  0x1b   :  { %p130_p11 = scmp.ne.s32.totalorder %s28_s24, %s129_s4  ;;  %p135_p13 = scmp.lt.s32.totalorder %s129_s4, %s129_s4 }
  0x1d   :  { %p136_p0 = por %p135_p13, %p134_p12 }
  0x1f   :  { %p137_p1 = pnand %p136_p0, %p130_p11 }
  0x21   :  { %140 = shalt.err (!%p137_p1)
}
  0x22   :  { %33 = dma.hbm_to_vmem [thread:$0]  %s226_s1, 256, %s28_s24, [#allocation6], %s170_s19, %s170_s19, %s171_s20  }
  0x23   :  { %163 = dma.done.wait [#allocation3], 256  }
  0x24   :  { %164 = vsyncadd [#allocation3], 4294967040 }
  0x25   :  { %165 = dma.done.wait [#allocation6], 256  }
  0x26   :  { %166 = vsyncadd [#allocation6], 4294967040  ;;  %v47_v0 = vld [vmem:[#allocation5] sm:$0xff]  ;;  %v48_v1 = vld [vmem:[#allocation5 + $0x8] sm:$0xff]  ;;  %s173_s1 = smov [#allocation7]  }
  0x27   :  { %v51_v2 = vadd.f32 1.0, %v47_v0  ;;  %v52_v3 = vadd.f32 1.0, %v48_v1  ;;  %v45_v4 = vld [vmem:[#allocation2] sm:$0xff]  ;;  %v46_v5 = vld [vmem:[#allocation2 + $0x8] sm:$0xff]  ;;  %s73_s6 = sshll.u32 %s173_s1, 4  ;;  %s74_s6 = int_to_ptr.vmem [resolvable:$true] %s73_s6 }
  0x28   :  { %v49_v6 = vadd.f32 1.0, %v45_v4  ;;  %v50_v7 = vadd.f32 1.0, %v46_v5  ;;  %s141_s7 = scalar_lea.vmem %s74_s6, 128  ;;  %p146_p3 = scmp.lt.s32.totalorder %s74_s6, %s74_s6 }
  0x29   :  { %89 = vrcp.f32 %v51_v2  ;;  %p142_p2 = scmp.ne.s32.totalorder %s74_s6, %s141_s7  ;;  %p147_p4 = scmp.lt.s32.totalorder %s141_s7, %s141_s7 }
  0x2a   :  { %91 = vrcp.f32 %v52_v3 }
  0x2b   :  { %p148_p5 = por %p147_p4, %p146_p3 }
  0x2d   :  { %p149_p6 = pnand %p148_p5, %p142_p2 }
  0x33   :  { %v90_v8 = vpop.eup %89 }
  0x34   :  { %v92_v9 = vpop.eup %91  ;;  %v54_v10 = vmul.f32 %v90_v8, %v49_v6 }
  0x35   :  { %v56_v11 = vmul.f32 %v92_v9, %v50_v7 }
  0x36   :  { %93 = vlog2.f32 %v54_v10 }
  0x37   :  { %95 = vlog2.f32 %v56_v11 }
  0x40   :  { %v94_v12 = vpop.eup %93 }
  0x41   :  { %v96_v13 = vpop.eup %95  ;;  %v58_v14 = vmul.f32 0.6931472, %v94_v12 }
  0x42   :  { %v60_v15 = vmul.f32 0.6931472, %v96_v13 }
  0x43   :  { %v61_v16 = vmul.f32 %v58_v14, %v58_v14 }
  0x44   :  { %v62_v17 = vmul.f32 %v60_v15, %v60_v15 }
  0x46   :  { %v64_v18 = vadd.f32 %v62_v17, %v61_v16 }
  0x48   :  { %66 = vst [vmem:[#allocation7] sm:$0xff] %v64_v18 }
  0x49   :  { %152 = shalt.err (!%p149_p6)
}
  0x4a   :  { %s153_s10 = scalar_lea.hbm %s227_s2, 128 }
  0x4b   :  { %p154_p7 = scmp.ne.s32.totalorder %s227_s2, %s153_s10  ;;  %p157_p8 = scmp.lt.u32.totalorder %s153_s10, %s227_s2 }
  0x4d   :  { %p159_p9 = pnand %p157_p8, %p154_p7 }
  0x4f   :  { %162 = shalt.err (!%p159_p9)
}
  0x50   :  { %76 = dma.vmem_to_hbm [thread:$0]  %s74_s6, 128, %s227_s2, [#allocation4]  }
  0x51   :  { %167 = dma.done.wait [#allocation4], 128  }
  0x52   :  { %168 = vsyncadd [#allocation4], 4294967168 }
  0x53   :  { %80 = vsyncpa [#allocation3], 1 }
  0x54   :  { %81 = vsyncpa [#allocation6], 1 }
  0x55   :  { %82 = vsyncpa [#allocation4], 1 }

</bundles_post_ra>
